<compile_context>
chip_gen: v7x
topology: tpu7x:2x2x1
jax: 0.10.0
libtpu: 0.0.40
codegen_flags: <defaults>
</compile_context>

<pallas_src>
import math

import jax
import jax.numpy as jnp
from jax.experimental import pallas as pl
from jax.experimental.pallas import tpu as pltpu


def _relu_kernel(x_ref, o_ref):
    x = x_ref[...]
    o_ref[...] = jnp.maximum(x, jnp.zeros((), dtype=x.dtype))


def _round_up(a: int, b: int) -> int:
    return ((a + b - 1) // b) * b


def _vmem_capacity_bytes() -> int:
    try:
        info = pltpu.get_tpu_info()
        v = getattr(info, "vmem_capacity_bytes", None)
        if v:
            return int(v)
    except Exception:
        pass
    return 64 * 1024 * 1024  # conservative default (v7x per-TC VMEM)


def andhra_forward(x):
    """x: any-shape array (e.g. NCHW). Returns (relu(x), relu(x))."""
    orig_shape = x.shape
    dtype = x.dtype
    itemsize = jnp.dtype(dtype).itemsize
    # dtype-aware sublane packing granularity: f32 -> 8, bf16 -> 16, int8/fp8 -> 32
    sub = {4: 8, 2: 16, 1: 32}.get(itemsize, 8)

    total = x.size

    # ---- Zero-copy lane-dense 2-D view --------------------------------------
    lanes = None
    for cand in (1024, 512, 256, 128):
        if total % cand == 0:
            lanes = cand
            break

    padded_total = total
    x_flat = x.reshape(-1)  # contiguous row-major flatten: free (bitcast) under jit
    if lanes is None:
        # Ragged total (not a multiple of 128): rare for NN tensors. Minimal pad.
        # TODO(synk): a masked-tail in-kernel path would avoid the pad/slice passes.
        lanes = 128
        padded_total = _round_up(total, lanes)
        x_flat = jnp.pad(x_flat, (0, padded_total - total))
    rows = padded_total // lanes
    x2d = x_flat.reshape(rows, lanes)

    # ---- Generation-aware tile sizing ----------------------------------------
    vmem_cap = _vmem_capacity_bytes()
    # Resident footprint ≈ 2 buffers (double-buffered) x (in + out) = 4 x block.
    vmem_budget = min(vmem_cap // 2, 48 * 1024 * 1024)   # v5e/v6e: 48 MiB, v7x: 32 MiB
    target_block_bytes = max(2 * 1024 * 1024, vmem_budget // 4)

    bytes_per_row = lanes * itemsize
    if rows <= sub:
        tile_rows = rows  # full-dim block (allowed by the (8,128) rule)
    else:
        max_tile_rows = max(sub, (target_block_bytes // bytes_per_row) // sub * sub)
        # Keep >= ~8 grid steps when data allows: DMA overlap + even 2-TC split.
        tile_for_8_steps = _round_up(math.ceil(rows / 8), sub)
        tile_rows = max(sub, min(max_tile_rows, tile_for_8_steps))

    num_steps = -(-rows // tile_rows)
    grid = (num_steps,)
    spec = pl.BlockSpec((tile_rows, lanes), lambda i: (i, 0))

    vmem_limit = min(vmem_cap, 4 * tile_rows * bytes_per_row + 16 * 1024 * 1024)

    out = pl.pallas_call(
        _relu_kernel,
        out_shape=jax.ShapeDtypeStruct((rows, lanes), dtype),
        grid_spec=pltpu.PrefetchScalarGridSpec(
            num_scalar_prefetch=0,
            grid=grid,
            in_specs=[spec],
            out_specs=spec,
        ),
        compiler_params=pltpu.CompilerParams(
            dimension_semantics=("parallel",),  # shards grid across TCs on v7x
            vmem_limit_bytes=vmem_limit,
        ),
        # NOTE: if the caller donates x (dead after this op), adding
        # input_output_aliases={0: 0} would reuse the input HBM buffer.
        cost_estimate=pl.CostEstimate(
            flops=total,
            transcendentals=0,
            bytes_accessed=2 * total * itemsize,  # 1 read + 1 write
        ),
    )(x2d)

    out_flat = out.reshape(-1)
    if padded_total != total:
        out_flat = out_flat[:total]
    o = out_flat.reshape(orig_shape)

    # Both PyTorch branches produce identical values; returning the same
    # immutable JAX array twice is semantically equivalent and avoids a
    # second full-tensor HBM write.
    return o, o


if __name__ == "__main__":
    key = jax.random.PRNGKey(0)
    # Small NCHW input consistent with a conv-style module: B=2, C=4, H=W=16.
    x = jax.random.normal(key, (2, 4, 16, 16), dtype=jnp.float32)

    fwd = jax.jit(andhra_forward)
    x1, x2 = fwd(x)
    jax.block_until_ready((x1, x2))

    # Correctness check against plain-JAX reference of the PyTorch semantics.
    ref = jnp.maximum(x, 0.0)
    assert x1.shape == x.shape and x2.shape == x.shape
    assert jnp.allclose(x1, ref) and jnp.allclose(x2, ref)

    print("KERNEL_OK")
</pallas_src>

<mosaic_0001>
module attributes {stable_mosaic.version = 11 : i64} {
  func.func @_relu_kernel(%arg0: i32, %arg1: memref<2x1024xf32, #tpu.memory_space<vmem>>, %arg2: memref<2x1024xf32, #tpu.memory_space<vmem>>) attributes {dimension_semantics = [#tpu.dimension_semantics<parallel>], iteration_bounds = array<i64: 1>, scalar_prefetch = 0 : i64, scratch_operands = 0 : i64, tpu.core_type = #tpu.core_type<tc>, window_params = [{transform_indices = @transform_0, window_bounds = array<i64: 2, 1024>}, {transform_indices = @transform_1, window_bounds = array<i64: 2, 1024>}]} {
    %c0 = arith.constant 0 : index
    %c0_0 = arith.constant 0 : index
    %0 = vector.load %arg1[%c0, %c0_0] : memref<2x1024xf32, #tpu.memory_space<vmem>>, vector<2x1024xf32>
    %cst = arith.constant 0.000000e+00 : f32
    %1 = vector.broadcast %cst : f32 to vector<2x1024xf32>
    %2 = arith.maximumf %0, %1 : vector<2x1024xf32>
    %c0_1 = arith.constant 0 : index
    %c0_2 = arith.constant 0 : index
    %3 = vector.load %arg2[%c0_1, %c0_2] : memref<2x1024xf32, #tpu.memory_space<vmem>>, vector<2x1024xf32>
    tpu.vector_store %arg2[%c0_1, %c0_2], %2 {strides = array<i32>} : memref<2x1024xf32, #tpu.memory_space<vmem>>, vector<2x1024xf32>,
    return
  }
  func.func @transform_0(%arg0: i32) -> (i32, i32) {
    %c0_i32 = arith.constant 0 : i32
    %c0_i32_0 = arith.constant 0 : i32
    return %arg0, %c0_i32 : i32, i32
  }
  func.func @transform_1(%arg0: i32) -> (i32, i32) {
    %c0_i32 = arith.constant 0 : i32
    %c0_i32_0 = arith.constant 0 : i32
    return %arg0, %c0_i32 : i32, i32
  }
}

</mosaic_0001>

<bundles_post_ra>
// kernel: andhra_forward.1
= control target key start
LH: loop header
LB: loop body
LE: loop exit
PB: predicated region body
PF: predicated region fallthrough
CT: control target
= control target key end

     0   :  { %s40_s0 = inlined_call_operand.vmem [shape: f32[2,1024], index: 0, kind: input, shape index: {}]   ;;  %s41_s1 = inlined_call_operand.vmem [shape: f32[2,1024], index: 1, kind: output, shape index: {}]  }
   0x1   :  { %v8_v0 = vld [vmem:[%s40_s0] sm:$0xff]  ;;  %v9_v1 = vld [vmem:[%s40_s0 + $0x8] sm:$0xff] }
   0x2   :  { %v10_v2 = vmax.f32 %v8_v0, 0.0  ;;  %v11_v3 = vmax.f32 %v9_v1, 0.0 }
   0x4   :  { %12 = vst [vmem:[%s41_s1] sm:$0xff] %v10_v2  ;;  %13 = vst [vmem:[%s41_s1 + $0x8] sm:$0xff] %v11_v3 }

</bundles_post_ra>
